<compile_context>
chip_gen: v7x
topology: tpu7x:2x2x1
jax: 0.10.0
libtpu: 0.0.40
codegen_flags: <defaults>
</compile_context>

<pallas_src>
import jax
import jax.numpy as jnp
from jax.experimental import pallas as pl
from jax.experimental.pallas import tpu as pltpu

_LANES = 128
_EPS = 1e-6


def _make_epe_kernel(num_channels: int, has_mask: bool):
    """Kernel body. Works for both the packed 4-D (1, C, th, 128) layout and the
    flattened 3-D (1, C, th*128) fallback layout; all intermediates are >= 2-D."""

    def _epe(flow_ref, gt_ref):
        # Unrolled per-channel accumulation -> stays on the VPU (C is tiny & static).
        d = flow_ref[0, 0:1].astype(jnp.float32) - gt_ref[0, 0:1].astype(jnp.float32)
        s = d * d
        for c in range(1, num_channels):
            d = flow_ref[0, c:c + 1].astype(jnp.float32) - gt_ref[0, c:c + 1].astype(jnp.float32)
            s = s + d * d
        return jnp.sqrt(s + _EPS)            # sqrt -> EUP (off the critical path)

    if has_mask:

        def kernel(flow_ref, gt_ref, mask_ref, out_ref):
            e = _epe(flow_ref, gt_ref) * mask_ref[0].astype(jnp.float32)
            out_ref[0] = e.astype(out_ref.dtype)

    else:

        def kernel(flow_ref, gt_ref, out_ref):
            out_ref[0] = _epe(flow_ref, gt_ref).astype(out_ref.dtype)

    return kernel


def _pick_chunks_per_tile(total, batch, max_chunks, per_chunk_bytes, vmem_budget, gran):
    """Tile height in 128-lane chunks.

    Budgeted against `vmem_budget` of double-buffered VMEM, capped by
    `max_chunks`, rounded to `gran` (sublane-packing granularity). When the batch
    is 1, the chunk axis is split so the grid has >= 2 parallel steps (v7x has two
    TensorCores). Partial last blocks are fine: the grid uses cdiv and Pallas masks."""
    cap = max(1, int(vmem_budget) // (2 * per_chunk_bytes))  # 2x: double buffering
    th = min(total, max_chunks, cap)
    if batch == 1 and th >= total and total > gran:
        th = total // 2
    if th >= total:
        return total                       # single full-extent block (always legal)
    return max(gran, (th // gran) * gran)


def epe(flow, gt, loss_mask=None, *, max_rows_per_tile: int = 512,
        vmem_budget_bytes: int = 8 * 1024 * 1024, out_dtype=None):
    """EPE loss map.

    flow, gt: (N, C, H, W) (any float dtype; DMA'd natively, upcast in-kernel).
    loss_mask: (N, 1, H, W) or None (bool masks are passed as a 1-byte stream).
    Returns (N, 1, H, W) in `out_dtype` (default: flow.dtype).
    """
    N, C, H, W = flow.shape
    HW = H * W
    if out_dtype is None:
        out_dtype = flow.dtype

    has_mask = loss_mask is not None
    mask = None
    if has_mask:
        mask = loss_mask
        if jnp.issubdtype(mask.dtype, jnp.bool_):
            mask = mask.astype(jnp.int8)   # 1-byte stream; converted on the VPU in-kernel

    fb = jnp.dtype(flow.dtype).itemsize
    gb = jnp.dtype(gt.dtype).itemsize
    mb = jnp.dtype(mask.dtype).itemsize if has_mask else 0
    ob = jnp.dtype(out_dtype).itemsize

    dense = (HW % _LANES) == 0
    if dense:
        # Fully-packed (rows, 128) layout: free wrapper reshape, dense sublanes.
        chunks = HW // _LANES
        per_chunk = _LANES * (C * (fb + gb) + mb + ob)
        min_b = min([fb, gb, ob] + ([mb] if has_mask else []))
        gran = 8 * max(1, 4 // min_b)      # 8 (f32) / 16 (bf16) / 32 (int8)
    else:
        # Single-pass fallback on the flattened HW axis (no wrapper pad/slice passes).
        chunks = -(-HW // _LANES)
        pad8 = ((C + 7) // 8) * 8          # sublane padding of the (C, BLK) block
        per_chunk = _LANES * (pad8 * (fb + gb) + 8 * mb + 8 * ob)
        gran = 1                           # block last dim is th*128: always aligned

    th = _pick_chunks_per_tile(chunks, N, max_rows_per_tile, per_chunk,
                               vmem_budget_bytes, gran)
    grid = (N, -(-chunks // th))

    if dense:
        flow_in = flow.reshape(N, C, chunks, _LANES)
        gt_in = gt.reshape(N, C, chunks, _LANES)
        mask_in = mask.reshape(N, 1, chunks, _LANES) if has_mask else None
        blk_f = (1, C, th, _LANES)
        blk_o = (1, 1, th, _LANES)
        imap = lambda n, t: (n, 0, t, 0)
        out_struct = jax.ShapeDtypeStruct((N, 1, chunks, _LANES), out_dtype)
    else:
        flow_in = flow.reshape(N, C, HW)
        gt_in = gt.reshape(N, C, HW)
        mask_in = mask.reshape(N, 1, HW) if has_mask else None
        blk_f = (1, C, th * _LANES)
        blk_o = (1, 1, th * _LANES)
        imap = lambda n, t: (n, 0, t)
        out_struct = jax.ShapeDtypeStruct((N, 1, HW), out_dtype)

    in_specs = [pl.BlockSpec(blk_f, imap), pl.BlockSpec(blk_f, imap)]
    inputs = [flow_in, gt_in]
    if has_mask:
        in_specs.append(pl.BlockSpec(blk_o, imap))
        inputs.append(mask_in)
    out_spec = pl.BlockSpec(blk_o, imap)

    cost = pl.CostEstimate(
        flops=(3 * C + 2) * N * HW,
        transcendentals=N * HW,
        bytes_accessed=N * HW * (C * (fb + gb) + mb + ob),
    )

    out = pl.pallas_call(
        _make_epe_kernel(C, has_mask),
        out_shape=out_struct,
        grid_spec=pltpu.PrefetchScalarGridSpec(
            num_scalar_prefetch=0,
            grid=grid,
            in_specs=in_specs,
            out_specs=out_spec,
        ),
        compiler_params=pltpu.CompilerParams(
            dimension_semantics=("parallel", "parallel"),
        ),
        cost_estimate=cost,
    )(*inputs)

    return out.reshape(N, 1, H, W)


def _epe_ref(flow, gt, loss_mask=None):
    f = flow.astype(jnp.float32)
    g = gt.astype(jnp.float32)
    loss_map = (f - g) ** 2
    loss_map = jnp.sqrt(loss_map.sum(axis=1, keepdims=True) + _EPS)
    if loss_mask is not None:
        loss_map = loss_map * loss_mask.astype(jnp.float32)
    return loss_map


if __name__ == "__main__":
    key = jax.random.PRNGKey(0)
    k1, k2, k3 = jax.random.split(key, 3)

    # 1) f32, C=4, 16x16, f32 mask (dense path, single full-extent block).
    N, C, H, W = 2, 4, 16, 16
    flow = jax.random.normal(k1, (N, C, H, W), dtype=jnp.float32)
    gt = jax.random.normal(k2, (N, C, H, W), dtype=jnp.float32)
    mask = (jax.random.uniform(k3, (N, 1, H, W)) > 0.3).astype(jnp.float32)
    out = jax.block_until_ready(epe(flow, gt, mask))
    assert out.shape == (N, 1, H, W)
    assert jnp.allclose(out, _epe_ref(flow, gt, mask), atol=1e-5, rtol=1e-5), "mask path"

    # 2) no-mask path.
    out_nm = jax.block_until_ready(epe(flow, gt, None))
    assert jnp.allclose(out_nm, _epe_ref(flow, gt, None), atol=1e-5, rtol=1e-5), "no-mask path"

    # 3) dense path, multi-block grid with a masked partial last block (f32, C=2).
    H2, W2 = 20, 128   # rows = 20, th -> 16, grid (N, 2), last block covers 4 rows
    f2 = jax.random.normal(k1, (N, 2, H2, W2), dtype=jnp.float32)
    g2 = jax.random.normal(k2, (N, 2, H2, W2), dtype=jnp.float32)
    m2 = (jax.random.uniform(k3, (N, 1, H2, W2)) > 0.5).astype(jnp.float32)
    out2 = jax.block_until_ready(epe(f2, g2, m2, max_rows_per_tile=16))
    assert jnp.allclose(out2, _epe_ref(f2, g2, m2), atol=1e-5, rtol=1e-5), "partial block"

    # 4) bf16 inputs + int8 mask (native-dtype streams, bf16 output).
    H3, W3 = 128, 128
    f3 = jax.random.normal(k1, (N, 2, H3, W3), dtype=jnp.bfloat16)
    g3 = jax.random.normal(k2, (N, 2, H3, W3), dtype=jnp.bfloat16)
    m3 = (jax.random.uniform(k3, (N, 1, H3, W3)) > 0.5).astype(jnp.int8)
    out3 = jax.block_until_ready(epe(f3, g3, m3, max_rows_per_tile=96))
    assert out3.dtype == jnp.bfloat16
    assert jnp.allclose(out3.astype(jnp.float32), _epe_ref(f3, g3, m3),
                        atol=5e-2, rtol=5e-2), "bf16 path"

    # 5) ragged H*W (not a multiple of 128): single-pass fallback, bool mask.
    H4, W4 = 10, 12
    f4 = jax.random.normal(k1, (N, 2, H4, W4), dtype=jnp.float32)
    g4 = jax.random.normal(k2, (N, 2, H4, W4), dtype=jnp.float32)
    m4 = jax.random.uniform(k3, (N, 1, H4, W4)) > 0.5
    out4 = jax.block_until_ready(epe(f4, g4, m4))
    assert jnp.allclose(out4, _epe_ref(f4, g4, m4), atol=1e-5, rtol=1e-5), "ragged path"

    print("KERNEL_OK")
</pallas_src>

<mosaic_0001>
module attributes {stable_mosaic.version = 11 : i64} {
  func.func @kernel(%arg0: i32, %arg1: i32, %arg2: memref<1x4x2x128xf32, #tpu.memory_space<vmem>>, %arg3: memref<1x4x2x128xf32, #tpu.memory_space<vmem>>, %arg4: memref<1x1x2x128xf32, #tpu.memory_space<vmem>>, %arg5: memref<1x1x2x128xf32, #tpu.memory_space<vmem>>) attributes {dimension_semantics = [#tpu.dimension_semantics<parallel>, #tpu.dimension_semantics<parallel>], iteration_bounds = array<i64: 2, 1>, scalar_prefetch = 0 : i64, scratch_operands = 0 : i64, tpu.core_type = #tpu.core_type<tc>, window_params = [{transform_indices = @transform_0, window_bounds = array<i64: 1, 4, 2, 128>}, {transform_indices = @transform_1, window_bounds = array<i64: 1, 4, 2, 128>}, {transform_indices = @transform_2, window_bounds = array<i64: 1, 1, 2, 128>}, {transform_indices = @transform_3, window_bounds = array<i64: 1, 1, 2, 128>}]} {
    %c0 = arith.constant 0 : index
    %c0_0 = arith.constant 0 : index
    %c0_1 = arith.constant 0 : index
    %c0_2 = arith.constant 0 : index
    %0 = vector.load %arg2[%c0, %c0_0, %c0_1, %c0_2] : memref<1x4x2x128xf32, #tpu.memory_space<vmem>>, vector<1x1x2x128xf32>
    %1 = vector.shape_cast %0 : vector<1x1x2x128xf32> to vector<1x2x128xf32>
    %c0_3 = arith.constant 0 : index
    %c0_4 = arith.constant 0 : index
    %c0_5 = arith.constant 0 : index
    %c0_6 = arith.constant 0 : index
    %2 = vector.load %arg3[%c0_3, %c0_4, %c0_5, %c0_6] : memref<1x4x2x128xf32, #tpu.memory_space<vmem>>, vector<1x1x2x128xf32>
    %3 = vector.shape_cast %2 : vector<1x1x2x128xf32> to vector<1x2x128xf32>
    %4 = arith.subf %1, %3 : vector<1x2x128xf32>
    %5 = arith.mulf %4, %4 : vector<1x2x128xf32>
    %c0_7 = arith.constant 0 : index
    %c1 = arith.constant 1 : index
    %c0_8 = arith.constant 0 : index
    %c0_9 = arith.constant 0 : index
    %6 = vector.load %arg2[%c0_7, %c1, %c0_8, %c0_9] : memref<1x4x2x128xf32, #tpu.memory_space<vmem>>, vector<1x1x2x128xf32>
    %7 = vector.shape_cast %6 : vector<1x1x2x128xf32> to vector<1x2x128xf32>
    %c0_10 = arith.constant 0 : index
    %c1_11 = arith.constant 1 : index
    %c0_12 = arith.constant 0 : index
    %c0_13 = arith.constant 0 : index
    %8 = vector.load %arg3[%c0_10, %c1_11, %c0_12, %c0_13] : memref<1x4x2x128xf32, #tpu.memory_space<vmem>>, vector<1x1x2x128xf32>
    %9 = vector.shape_cast %8 : vector<1x1x2x128xf32> to vector<1x2x128xf32>
    %10 = arith.subf %7, %9 : vector<1x2x128xf32>
    %11 = arith.mulf %10, %10 : vector<1x2x128xf32>
    %12 = arith.addf %5, %11 : vector<1x2x128xf32>
    %c0_14 = arith.constant 0 : index
    %c2 = arith.constant 2 : index
    %c0_15 = arith.constant 0 : index
    %c0_16 = arith.constant 0 : index
    %13 = vector.load %arg2[%c0_14, %c2, %c0_15, %c0_16] : memref<1x4x2x128xf32, #tpu.memory_space<vmem>>, vector<1x1x2x128xf32>
    %14 = vector.shape_cast %13 : vector<1x1x2x128xf32> to vector<1x2x128xf32>
    %c0_17 = arith.constant 0 : index
    %c2_18 = arith.constant 2 : index
    %c0_19 = arith.constant 0 : index
    %c0_20 = arith.constant 0 : index
    %15 = vector.load %arg3[%c0_17, %c2_18, %c0_19, %c0_20] : memref<1x4x2x128xf32, #tpu.memory_space<vmem>>, vector<1x1x2x128xf32>
    %16 = vector.shape_cast %15 : vector<1x1x2x128xf32> to vector<1x2x128xf32>
    %17 = arith.subf %14, %16 : vector<1x2x128xf32>
    %18 = arith.mulf %17, %17 : vector<1x2x128xf32>
    %19 = arith.addf %12, %18 : vector<1x2x128xf32>
    %c0_21 = arith.constant 0 : index
    %c3 = arith.constant 3 : index
    %c0_22 = arith.constant 0 : index
    %c0_23 = arith.constant 0 : index
    %20 = vector.load %arg2[%c0_21, %c3, %c0_22, %c0_23] : memref<1x4x2x128xf32, #tpu.memory_space<vmem>>, vector<1x1x2x128xf32>
    %21 = vector.shape_cast %20 : vector<1x1x2x128xf32> to vector<1x2x128xf32>
    %c0_24 = arith.constant 0 : index
    %c3_25 = arith.constant 3 : index
    %c0_26 = arith.constant 0 : index
    %c0_27 = arith.constant 0 : index
    %22 = vector.load %arg3[%c0_24, %c3_25, %c0_26, %c0_27] : memref<1x4x2x128xf32, #tpu.memory_space<vmem>>, vector<1x1x2x128xf32>
    %23 = vector.shape_cast %22 : vector<1x1x2x128xf32> to vector<1x2x128xf32>
    %24 = arith.subf %21, %23 : vector<1x2x128xf32>
    %25 = arith.mulf %24, %24 : vector<1x2x128xf32>
    %26 = arith.addf %19, %25 : vector<1x2x128xf32>
    %cst = arith.constant 9.99999997E-7 : f32
    %27 = vector.broadcast %cst : f32 to vector<1x2x128xf32>
    %28 = arith.addf %26, %27 : vector<1x2x128xf32>
    %29 = math.sqrt %28 : vector<1x2x128xf32>
    %c0_28 = arith.constant 0 : index
    %c0_29 = arith.constant 0 : index
    %c0_30 = arith.constant 0 : index
    %c0_31 = arith.constant 0 : index
    %30 = vector.load %arg4[%c0_28, %c0_29, %c0_30, %c0_31] : memref<1x1x2x128xf32, #tpu.memory_space<vmem>>, vector<1x1x2x128xf32>
    %31 = vector.shape_cast %30 : vector<1x1x2x128xf32> to vector<1x2x128xf32>
    %32 = arith.mulf %29, %31 : vector<1x2x128xf32>
    %c0_32 = arith.constant 0 : index
    %c0_33 = arith.constant 0 : index
    %c0_34 = arith.constant 0 : index
    %c0_35 = arith.constant 0 : index
    %33 = vector.load %arg5[%c0_32, %c0_33, %c0_34, %c0_35] : memref<1x1x2x128xf32, #tpu.memory_space<vmem>>, vector<1x1x2x128xf32>
    %34 = vector.shape_cast %33 : vector<1x1x2x128xf32> to vector<1x2x128xf32>
    %35 = vector.shape_cast %32 : vector<1x2x128xf32> to vector<1x1x2x128xf32>
    tpu.vector_store %arg5[%c0_32, %c0_33, %c0_34, %c0_35], %35 {strides = array<i32>} : memref<1x1x2x128xf32, #tpu.memory_space<vmem>>, vector<1x1x2x128xf32>,
    return
  }
  func.func @transform_0(%arg0: i32, %arg1: i32) -> (i32, i32, i32, i32) {
    %c0_i32 = arith.constant 0 : i32
    %c0_i32_0 = arith.constant 0 : i32
    %c0_i32_1 = arith.constant 0 : i32
    return %arg0, %c0_i32, %arg1, %c0_i32_0 : i32, i32, i32, i32
  }
  func.func @transform_1(%arg0: i32, %arg1: i32) -> (i32, i32, i32, i32) {
    %c0_i32 = arith.constant 0 : i32
    %c0_i32_0 = arith.constant 0 : i32
    %c0_i32_1 = arith.constant 0 : i32
    return %arg0, %c0_i32, %arg1, %c0_i32_0 : i32, i32, i32, i32
  }
  func.func @transform_2(%arg0: i32, %arg1: i32) -> (i32, i32, i32, i32) {
    %c0_i32 = arith.constant 0 : i32
    %c0_i32_0 = arith.constant 0 : i32
    %c0_i32_1 = arith.constant 0 : i32
    return %arg0, %c0_i32, %arg1, %c0_i32_0 : i32, i32, i32, i32
  }
  func.func @transform_3(%arg0: i32, %arg1: i32) -> (i32, i32, i32, i32) {
    %c0_i32 = arith.constant 0 : i32
    %c0_i32_0 = arith.constant 0 : i32
    %c0_i32_1 = arith.constant 0 : i32
    return %arg0, %c0_i32, %arg1, %c0_i32_0 : i32, i32, i32, i32
  }
}

</mosaic_0001>

<bundles_post_ra>
// kernel: tpu_custom_call.1
= control target key start
LH: loop header
LB: loop body
LE: loop exit
PB: predicated region body
PF: predicated region fallthrough
CT: control target
= control target key end

     0   :  { %8 = vsyncpa [#allocation3], 0  ;;  %s960_s0 = inlined_call_operand.hbm [shape: f32[2,4,2,128], index: 0, kind: input, shape index: {}]   ;;  %s961_s1 = inlined_call_operand.hbm [shape: f32[2,4,2,128], index: 1, kind: input, shape index: {}]   ;;  %s962_s2 = inlined_call_operand.vmem [shape: f32[2,1,2,128], index: 2, kind: input, shape index: {}]   ;;  %s963_s3 = inlined_call_operand.hbm [shape: f32[2,1,2,128], index: 3, kind: output, shape index: {}]  }
   0x1   :  { %10 = vsyncpa [#allocation3 + $0x1], 0 }
   0x2   :  { %11 = vsyncpa [#allocation6], 0 }
   0x3   :  { %13 = vsyncpa [#allocation6 + $0x1], 0 }
   0x4   :  { %14 = vsyncpa [#allocation4], 0 }
   0x5   :  { %16 = vsyncpa [#allocation4 + $0x1], 0  ;;  %s720_s12 = smov 0   ;;  %s722_s13 = smov 0  }
   0x6   :  { %s724_s14 = smov 0   ;;  %s726_s15 = smov 0  }
   0x7   :  { %s728_s16 = smov 0   ;;  %s730_s17 = smov 0  }
   0x8 LB: > { %s449_s18 = sadd.s32 4294967295, %s693_s17   ;;  %s450_s19 = sadd.s32 4294967294, %s693_s17   ;;  %s693_s17 = sphi %s730_s17, %s22_s17   ;;  %s689_s16 = sphi %s728_s16, %s981_s16   ;;  %s685_s15 = sphi %s726_s15, %s980_s15   ;;  %s681_s14 = sphi %s724_s14, %s979_s14   ;;  %s677_s13 = sphi %s722_s13, %s978_s13   ;;  %s673_s12 = sphi %s720_s12, %s977_s12  }
   0x9   : > { %s34_s20 = sadd.s32 1, %s689_s16  ;;  %s43_s21 = sadd.s32 1, %s681_s14 }
   0xa   : > { %p36_p0 = scmp.ge.s32.totalorder %s34_s20, 2  ;;  %p50_p1 = scmp.ne.s32.totalorder %s681_s14, %s677_s13 }
   0xb   : > { %p51_p2 = scmp.eq.s32.totalorder %s693_s17, 0  ;;  %p56_p3 = scmp.ne.s32.totalorder %s677_s13, %s673_s12 }
   0xc   : > { %s983_s20 = smov (%p36_p0, %s34_s20), 0  ;;  %p57_p5 = scmp.eq.s32.totalorder %s449_s18, 0 }
   0xd   : > { %p761_p4 = por %p51_p2, %p50_p1  ;;  %s38_s23 = ssub.s32 %s689_s16, %s983_s20 }
   0xe   : > { %p138_p6 = scmp.eq.s32.totalorder %s449_s18, 1  ;;  %p41_p7 = scmp.eq.s32.totalorder %s38_s23, 0 }
   0xf   : > { %p767_p8 = por %p57_p5, %p56_p3  ;;  %p144_p10 = scmp.eq.s32.totalorder %s450_s19, 1 }
  0x10   : > { %p771_p9 = por %p138_p6, %p50_p1  ;;  %p493_p13 = scmp.lt.s32.totalorder %s693_s17, 2 }
  0x11   : > { %s967_s24 = scalar_select %p767_p8, 1, 0 }
  0x12   : > { %s968_s25 = scalar_select %p771_p9, 1, 0 }
  0x13   : > { %s776_s26 = scalar_select %p41_p7, %s681_s14, %s43_s21  }
  0x14   : > { %p778_p11 = por %p144_p10, %p56_p3  ;;  %s785_s28 = sand.u32 1, %s681_s14  }
  0x15   : > { %s453_s29 = sshll.u32 %s785_s28, 3  ;;  %s474_s30 = sshll.u32 %s689_s16, 7 }
  0x16   : > { %s969_s27 = scalar_select %p778_p11, 1, 0 }
  0x17   : > { %s794_s6 = scalar_lea.hbm %s960_s0, %s474_s30  ;;  %s168_s7 = scalar_lea.vmem [#allocation2], %s453_s29 }
  0x18   : > { %s176_s8 = sshll.u32 %s168_s7, 4  ;;  %p802_p0 = pnand %p493_p13, %p761_p4  ;;  %s798_s8 = int_to_ptr.vmem [resolvable:$true] %s176_s8 }
  0x19   : > { %s165_s10 = scalar_lea.sflag [#allocation3], %s785_s28  ;;  %s547_s11 = scalar_lea.hbm %s794_s6, 128 }
  0x1a   : > { %p548_p2 = scmp.ne.s32.totalorder %s794_s6, %s547_s11  ;;  %p549_p3 = pneg %p802_p0 }
  0x1b   : > { %s552_s21 = scalar_lea.hbm %s960_s0, 256  ;;  %p553_p4 = scmp.lt.u32.totalorder %s794_s6, %s960_s0 }
  0x1c   : > { %p550_p5 = pnand %p549_p3, %p548_p2  ;;  %p554_p7 = scmp.lt.u32.totalorder %s552_s21, %s547_s11 }
  0x1d   : > { %p556_p13 = scmp.lt.u32.totalorder %s547_s11, %s794_s6 }
  0x1e   : > { %p551_p6 = pneg %p550_p5  ;;  %p555_p10 = por %p554_p7, %p553_p4 }
  0x20   : > { %p557_p12 = por %p556_p13, %p555_p10 }
  0x22   : > { %p558_p1 = pnand %p557_p12, %p551_p6 }
  0x24   : > { %561 = shalt.err (!%p558_p1)
}
  0x25   : > { %s562_s4 = scalar_lea.vmem %s798_s8, 128  ;;  %s695_s5 = smov [#allocation2]  }
  0x26   : > { %p563_p2 = scmp.ne.s32.totalorder %s798_s8, %s562_s4  ;;  %s567_s7 = sshll.u32 %s695_s5, 4  ;;  %s568_s7 = int_to_ptr.vmem [resolvable:$false] %s567_s7 }
  0x27   : > { %s569_s18 = scalar_lea.vmem %s568_s7, 256  ;;  %p570_p9 = scmp.lt.s32.totalorder %s798_s8, %s568_s7 }
  0x28   : > { %p565_p5 = pnand %p563_p2, %p549_p3  ;;  %p571_p4 = scmp.lt.s32.totalorder %s569_s18, %s562_s4 }
  0x2a   : > { %p566_p11 = pneg %p565_p5  ;;  %p572_p7 = por %p571_p4, %p570_p9 }
  0x2c   : > { %p573_p10 = pnand %p572_p7, %p566_p11 }
  0x2e   : > { %576 = shalt.err (!%p573_p10)
}
  0x2f   : > { %s696_s11 = smov 32   ;;  %s697_s19 = smov 2  }
  0x30   : > { %485 = dma.hbm_to_vmem [thread:$0]  (!%p802_p0), %s794_s6, 128, %s798_s8, %s165_s10, %s696_s11, %s696_s11, %s697_s19  }
  0x31   : > { %p216_p9 = scmp.lt.s32.totalorder %s693_s17, 3  ;;  %s844_s23 = scalar_lea.hbm %s961_s1, %s474_s30 }
  0x32   : > { %p971_p11 = scmp.ge.s32.totalorder %s693_s17, 1  ;;  %s190_s5 = scalar_lea.vmem [#allocation5], %s453_s29 }
  0x33   : > { %s198_s7 = sshll.u32 %s190_s5, 4  ;;  %s187_s6 = scalar_lea.sflag [#allocation6], %s785_s28  ;;  %s854_s7 = int_to_ptr.vmem [resolvable:$true] %s198_s7 }
  0x34   : > { %p848_p12 = pnand %p971_p11, %p216_p9  ;;  %s577_s8 = scalar_lea.hbm %s844_s23, 128 }
  0x35   : > { %p578_p1 = scmp.ne.s32.totalorder %s844_s23, %s577_s8  ;;  %s582_s18 = scalar_lea.hbm %s961_s1, 256 }
  0x36   : > { %p583_p2 = scmp.lt.u32.totalorder %s844_s23, %s961_s1  ;;  %p584_p5 = scmp.lt.u32.totalorder %s582_s18, %s577_s8 }
  0x37   : > { %p580_p6 = pnand %p578_p1, %p549_p3  ;;  %p586_p7 = scmp.lt.u32.totalorder %s577_s8, %s844_s23 }
  0x38   : > { %p585_p4 = por %p584_p5, %p583_p2 }
  0x39   : > { %p581_p13 = pneg %p580_p6 }
  0x3a   : > { %p587_p10 = por %p586_p7, %p585_p4 }
  0x3c   : > { %p588_p9 = pnand %p587_p10, %p581_p13 }
  0x3e   : > { %591 = shalt.err (!%p588_p9)
}
  0x3f   : > { %s592_s29 = scalar_lea.vmem %s854_s7, 128  ;;  %s698_s5 = smov [#allocation5]  }
  0x40   : > { %p593_p11 = scmp.ne.s32.totalorder %s854_s7, %s592_s29  ;;  %s597_s30 = sshll.u32 %s698_s5, 4  ;;  %s598_s30 = int_to_ptr.vmem [resolvable:$false] %s597_s30 }
  0x41   : > { %s599_s10 = scalar_lea.vmem %s598_s30, 256  ;;  %p600_p8 = scmp.lt.s32.totalorder %s854_s7, %s598_s30 }
  0x42   : > { %p595_p1 = pnand %p593_p11, %p549_p3  ;;  %p601_p2 = scmp.lt.s32.totalorder %s599_s10, %s592_s29 }
  0x44   : > { %p596_p6 = pneg %p595_p1  ;;  %p602_p5 = por %p601_p2, %p600_p8 }
  0x46   : > { %p603_p4 = pnand %p602_p5, %p596_p6 }
  0x48   : > { %606 = shalt.err (!%p603_p4)
}
  0x49   : > { %488 = dma.hbm_to_vmem [thread:$0]  (!%p802_p0), %s844_s23, 128, %s854_s7, %s187_s6, %s696_s11, %s696_s11, %s697_s19  }
  0x4a   : > { %220 = sbr.rel (%p848_p12) target bundleno = 129 (0x81), region = 32  ;;  %s888_s8 = sand.u32 (!%p848_p12), 1, %s677_s13  }
  0x4b   : > { %s460_s18 = sshll.u32 (!%p848_p12), %s888_s8, 3  ;;  %s223_s21 = scalar_lea.sflag (!%p848_p12), [#allocation3], %s888_s8 }
  0x4c   : > { %s226_s9 = scalar_lea.vmem (!%p848_p12), [#allocation2], %s460_s18  ;;  %p973_p8 = scmp.ne.s32.totalorder (!%p848_p12), %s967_s24, 0 }
  0x51   : > { %660 = dma.done.wait (%p973_p8), %s223_s21, 128  }
  0x52   : > { %662 = vsyncadd (%p973_p8), %s223_s21, 4294967168  ;;  %s232_s28 = scalar_lea.sflag [#allocation6], %s888_s8  ;;  %s235_s11 = scalar_lea.vmem [#allocation5], %s460_s18 }
  0x53   : > { %664 = dma.done.wait (%p973_p8), %s232_s28, 128  }
  0x54   : > { %666 = vsyncadd (%p973_p8), %s232_s28, 4294967168  ;;  %v277_v0 = vld [vmem:[%s226_s9] sm:$0x3]  ;;  %v278_v1 = vld [vmem:[%s235_s11] sm:$0x3]  ;;  %p270_p0 = scmp.lt.s32.totalorder %s685_s15, 1 }
  0x55   : > { %v464_v2 = vld [vmem:[%s226_s9 + $0x2] sm:$0x3]  ;;  %v279_v3 = vsub.f32 %v277_v0, %v278_v1  ;;  %v465_v4 = vld [vmem:[%s235_s11 + $0x2] sm:$0x3]  ;;  %v466_v5 = vld [vmem:[%s226_s9 + $0x4] sm:$0x3] }
  0x56   : > { %v467_v6 = vld [vmem:[%s235_s11 + $0x4] sm:$0x3]  ;;  %v285_v7 = vsub.f32 %v464_v2, %v465_v4  ;;  %v468_v9 = vld [vmem:[%s226_s9 + $0x6] sm:$0x3]  ;;  %v469_v10 = vld [vmem:[%s235_s11 + $0x6] sm:$0x3] }
  0x57   : > { %v292_v8 = vsub.f32 %v466_v5, %v467_v6  ;;  %v280_v11 = vmul.f32 %v279_v3, %v279_v3  ;;  %v299_v12 = vsub.f32 %v468_v9, %v469_v10  ;;  %s271_s24 = scalar_select %p270_p0, %s685_s15, 1 }
  0x58   : > { %v286_v13 = vmul.f32 %v285_v7, %v285_v7  ;;  %s462_s19 = sshll.u32 %s888_s8, 1  ;;  %s471_s5 = sshll.u32 %s685_s15, 5 }
  0x59   : > { %v293_v14 = vmul.f32 %v292_v8, %v292_v8  ;;  %v300_v16 = vmul.f32 %v299_v12, %v299_v12  ;;  %s463_s23 = sshll.u32 %s271_s24, 1  ;;  %s269_s22 = scalar_lea.vmem [#allocation7], %s462_s19 }
  0x5a   : > { %v287_v15 = vadd.f32 %v286_v13, %v280_v11  ;;  %s276_s6 = scalar_lea.vmem %s962_s2, %s463_s23  ;;  %s328_s29 = sshll.u32 %s269_s22, 4  ;;  %s908_s29 = int_to_ptr.vmem [resolvable:$true] %s328_s29 }
  0x5b   : > { %v310_v23 = vld [vmem:[%s276_s6] sm:$0x3]  ;;  %s913_s18 = scalar_lea.hbm %s963_s3, %s471_s5  ;;  %s314_s21 = scalar_lea.sflag [#allocation4], %s888_s8 }
  0x5c   : > { %v294_v17 = vadd.f32 %v293_v14, %v287_v15  ;;  %s607_s9 = scalar_lea.vmem %s908_s29, 32  ;;  %p974_p12 = scmp.ne.s32.totalorder %s968_s25, 0 }
  0x5d   : > { %p608_p3 = scmp.ne.s32.totalorder %s908_s29, %s607_s9  ;;  %s699_s15 = smov [#allocation7]  }
  0x5e   : > { %v301_v18 = vadd.f32 %v300_v16, %v294_v17  ;;  %s611_s28 = sshll.u32 %s699_s15, 4  ;;  %s612_s28 = int_to_ptr.vmem [resolvable:$false] %s611_s28 }
  0x5f   : > { %p609_p13 = pnand %p608_p3, %p974_p12  ;;  %s613_s11 = scalar_lea.vmem %s612_s28, 64 }
  0x60   : > { %v302_v19 = vadd.f32 1e-06, %v301_v18  ;;  %p614_p10 = scmp.lt.s32.totalorder %s908_s29, %s612_s28  ;;  %p615_p9 = scmp.lt.s32.totalorder %s613_s11, %s607_s9 }
  0x61   : > { %p610_p7 = pneg %p609_p13 }
  0x62   : > { %545 = vrsqrt.f32 %v302_v19  ;;  %vm305_vm0 = vcmp.eq.f32.partialorder %v302_v19, inf  ;;  %v308_v21 = vand.u32 2147483648, %v302_v19  ;;  %vm307_vm1 = vcmp.eq.f32.partialorder %v302_v19, 0.0  ;;  %p616_p11 = por %p615_p9, %p614_p10 }
  0x64   : > { %p617_p1 = pnand %p616_p11, %p610_p7 }
  0x6c   : > { %v546_v20 = vpop.eup %545 }
  0x6d   : > { %v304_v22 = vmul.f32 %v546_v20, %v302_v19 }
  0x6f   : > { %v306_v24 = vsel %vm305_vm0, %v302_v19, %v304_v22 }
  0x70   : > { %v309_v25 = vsel %vm307_vm1, %v308_v21, %v306_v24 }
  0x71   : > { %v311_v26 = vmul.f32 %v310_v23, %v309_v25 }
  0x73   : > { %312 = vst [vmem:[%s269_s22] sm:$0x3] %v311_v26 }
  0x74   : > { %620 = shalt.err (!%p617_p1)
}
  0x75   : > { %s621_s8 = scalar_lea.hbm %s913_s18, 32  ;;  %s625_s23 = scalar_lea.hbm %s963_s3, 64 }
  0x76   : > { %p622_p6 = scmp.ne.s32.totalorder %s913_s18, %s621_s8  ;;  %p626_p4 = scmp.lt.u32.totalorder %s913_s18, %s963_s3 }
  0x77   : > { %p627_p8 = scmp.lt.u32.totalorder %s625_s23, %s621_s8  ;;  %p629_p3 = scmp.lt.u32.totalorder %s621_s8, %s913_s18 }
  0x78   : > { %p623_p2 = pnand %p622_p6, %p974_p12 }
  0x79   : > { %p628_p0 = por %p627_p8, %p626_p4 }
  0x7a   : > { %p624_p5 = pneg %p623_p2 }
  0x7b   : > { %p630_p13 = por %p629_p3, %p628_p0 }
  0x7d   : > { %p631_p7 = pnand %p630_p13, %p624_p5 }
  0x7f   : > { %634 = shalt.err (!%p631_p7)
}
  0x80   : > { %480 = dma.vmem_to_hbm [thread:$0]  (%p974_p12), %s908_s29, 32, %s913_s18, %s314_s21  }
  0x81 PF: > { %s340_s6 = sand.u32 1, %s673_s12   ;;  %p975_p10 = scmp.ne.s32.totalorder %s969_s27, 0 }
  0x82   : > { %p976_p9 = scmp.ge.s32.totalorder %s693_s17, 2  ;;  %s341_s22 = scalar_lea.sflag [#allocation4], %s340_s6 }
  0x84   : > { %p490_p11 = pnand %p976_p9, %p975_p10 }
  0x86   : > { %668 = dma.done.wait (!%p490_p11), %s341_s22, 32  }
  0x87   : > { %670 = vsyncadd (!%p490_p11), %s341_s22, 4294967264  ;;  %s22_s17 = sadd.s32 1, %s693_s17   ;;  %s977_s12 = smov %s677_s13 }
  0x88   : > { %p19_p1 = scmp.ge.s32.totalorder %s22_s17, 4   ;;  %s978_s13 = smov %s681_s14 }
  0x89   : > { %s979_s14 = smov %s776_s26  ;;  %s980_s15 = smov %s689_s16 }
  0x8a   : > { %s981_s16 = smov %s983_s20  ;;  %21 = sbr.rel (!%p19_p1) target bundleno = 8 (0x8), region = 99 }
  0x91   :  { %346 = vsyncpa [#allocation3], 1 }
  0x92   :  { %348 = vsyncpa [#allocation3 + $0x1], 1 }
  0x93   :  { %349 = vsyncpa [#allocation6], 1 }
  0x94   :  { %351 = vsyncpa [#allocation6 + $0x1], 1 }
  0x95   :  { %352 = vsyncpa [#allocation4], 1 }
  0x96   :  { %354 = vsyncpa [#allocation4 + $0x1], 1 }

</bundles_post_ra>
